<compile_context>
chip_gen: v7x
topology: tpu7x:2x2x1
jax: 0.10.0
libtpu: 0.0.40
codegen_flags: <defaults>
</compile_context>

<pallas_src>
import jax
import jax.numpy as jnp
from jax.experimental import pallas as pl
from jax.experimental.pallas import tpu as pltpu


HEAD_PAD = 128  # lane-dense width for the fused logits+value head output


def _fcnet_kernel(obs_ref,
                  w1_ref, b1_ref,
                  w2_ref, b2_ref,
                  wh_ref, bh_ref,
                  out_ref):
    """Fused 2-hidden-layer tanh MLP with a single fused (padded) head.

    obs_ref : (TB, obs_dim)   batch tile (any float dtype; widened to f32)
    w*/b*   : VMEM-resident weights (index_map pins them to block (0, 0))
    wh/bh   : fused [logits | value | zero-pad] head, HEAD_PAD lanes wide
    out_ref : (TB, HEAD_PAD)  lane-dense output slab
    """
    x = obs_ref[...].astype(jnp.float32)

    h1 = jnp.tanh(
        jnp.dot(x, w1_ref[...], preferred_element_type=jnp.float32)
        + b1_ref[...])
    h2 = jnp.tanh(
        jnp.dot(h1, w2_ref[...], preferred_element_type=jnp.float32)
        + b2_ref[...])

    out = (jnp.dot(h2, wh_ref[...], preferred_element_type=jnp.float32)
           + bh_ref[...])
    out_ref[...] = out.astype(out_ref.dtype)


def fcnet_forward(obs, params, *, batch_tile=512):
    """Forward pass: returns (logits, value) exactly like the RLlib FC net."""
    (w1, b1, w2, b2, wl, bl, wv, bv) = params
    B, obs_dim = obs.shape
    hidden = w1.shape[1]
    num_outputs = wl.shape[1]

    # ---- Fuse the two heads into one lane-dense (128-wide) weight/bias. ----
    wh = jnp.zeros((hidden, HEAD_PAD), jnp.float32)
    wh = wh.at[:, :num_outputs].set(wl.astype(jnp.float32))
    wh = wh.at[:, num_outputs:num_outputs + 1].set(wv.astype(jnp.float32))
    bh = jnp.zeros((1, HEAD_PAD), jnp.float32)
    bh = bh.at[:, :num_outputs].set(bl.astype(jnp.float32))
    bh = bh.at[:, num_outputs:num_outputs + 1].set(bv.astype(jnp.float32))

    # ---- Batch tiling (pipeline obs / out DMA; weights stay resident). ----
    tb = B if B <= batch_tile else batch_tile   # batch_tile is a multiple of 8
    n_tiles = pl.cdiv(B, tb)
    Bp = n_tiles * tb
    obs_p = obs if Bp == B else jnp.pad(obs, ((0, Bp - B), (0, 0)))

    flops = 2 * Bp * (obs_dim * hidden + hidden * hidden + hidden * HEAD_PAD)
    transcendentals = 2 * Bp * hidden
    bytes_accessed = int(
        obs_p.size * obs_p.dtype.itemsize
        + sum(int(a.size) * 4 for a in (w1, b1, w2, b2, wh, bh))
        + Bp * HEAD_PAD * 4)

    def resident(a):
        nd = a.ndim
        return pl.BlockSpec(a.shape, lambda i, _nd=nd: (0,) * _nd)

    out = pl.pallas_call(
        _fcnet_kernel,
        out_shape=jax.ShapeDtypeStruct((Bp, HEAD_PAD), jnp.float32),
        grid=(n_tiles,),
        in_specs=[
            pl.BlockSpec((tb, obs_dim), lambda i: (i, 0)),   # obs: batch-tiled
            resident(w1), resident(b1),
            resident(w2), resident(b2),
            resident(wh), resident(bh),
        ],
        out_specs=pl.BlockSpec((tb, HEAD_PAD), lambda i: (i, 0)),
        compiler_params=pltpu.CompilerParams(
            dimension_semantics=("parallel",)),
        cost_estimate=pl.CostEstimate(
            flops=flops,
            transcendentals=transcendentals,
            bytes_accessed=bytes_accessed),
    )(obs_p, w1, b1, w2, b2, wh, bh)

    logits = out[:B, :num_outputs]
    value = out[:B, num_outputs:num_outputs + 1]
    return logits, value


def init_params(key, obs_dim, hidden, num_outputs):
    """Deterministic synthetic parameter init (shapes match RLlib fcnet)."""
    ks = jax.random.split(key, 8)
    scale = 0.1
    w1 = scale * jax.random.normal(ks[0], (obs_dim, hidden), jnp.float32)
    b1 = jnp.zeros((1, hidden), jnp.float32)
    w2 = scale * jax.random.normal(ks[1], (hidden, hidden), jnp.float32)
    b2 = jnp.zeros((1, hidden), jnp.float32)
    wl = scale * jax.random.normal(ks[2], (hidden, num_outputs), jnp.float32)
    bl = jnp.zeros((1, num_outputs), jnp.float32)
    wv = scale * jax.random.normal(ks[3], (hidden, 1), jnp.float32)
    bv = jnp.zeros((1, 1), jnp.float32)
    return (w1, b1, w2, b2, wl, bl, wv, bv)


def _reference(obs, params):
    """Pure-JAX reference (unfused heads) for correctness check."""
    (w1, b1, w2, b2, wl, bl, wv, bv) = params
    h1 = jnp.tanh(obs.astype(jnp.float32) @ w1 + b1)
    h2 = jnp.tanh(h1 @ w2 + b2)
    return h2 @ wl + bl, h2 @ wv + bv


if __name__ == "__main__":
    key = jax.random.PRNGKey(0)
    k_obs, k_params, k_big = jax.random.split(key, 3)

    batch = 8
    obs_dim = 32      # flattened observation space
    hidden = 32       # options["fcnet_hiddens"] = [32, 32]
    num_outputs = 4   # action space size

    params = init_params(k_params, obs_dim, hidden, num_outputs)

    # --- Small (toy) batch: single grid step, full-extent batch tile. ---
    obs = jax.random.normal(k_obs, (batch, obs_dim), jnp.float32)
    logits, value = fcnet_forward(obs, params)
    jax.block_until_ready((logits, value))

    ref_logits, ref_value = _reference(obs, params)
    assert logits.shape == (batch, num_outputs)
    assert value.shape == (batch, 1)
    assert jnp.allclose(logits, ref_logits, atol=1e-5, rtol=1e-5)
    assert jnp.allclose(value, ref_value, atol=1e-5, rtol=1e-5)

    # --- Larger, non-multiple batch: exercises tiling + padding path. ---
    big_batch = 1000
    obs_big = jax.random.normal(k_big, (big_batch, obs_dim), jnp.float32)
    logits_b, value_b = fcnet_forward(obs_big, params, batch_tile=512)
    jax.block_until_ready((logits_b, value_b))

    ref_logits_b, ref_value_b = _reference(obs_big, params)
    assert logits_b.shape == (big_batch, num_outputs)
    assert value_b.shape == (big_batch, 1)
    assert jnp.allclose(logits_b, ref_logits_b, atol=1e-4, rtol=1e-4)
    assert jnp.allclose(value_b, ref_value_b, atol=1e-4, rtol=1e-4)

    print("KERNEL_OK")
</pallas_src>

<mosaic_0001>
module attributes {stable_mosaic.version = 11 : i64} {
  func.func @_fcnet_kernel(%arg0: i32, %arg1: memref<8x32xf32, #tpu.memory_space<vmem>>, %arg2: memref<32x32xf32, #tpu.memory_space<vmem>>, %arg3: memref<1x32xf32, #tpu.memory_space<vmem>>, %arg4: memref<32x32xf32, #tpu.memory_space<vmem>>, %arg5: memref<1x32xf32, #tpu.memory_space<vmem>>, %arg6: memref<32x128xf32, #tpu.memory_space<vmem>>, %arg7: memref<1x128xf32, #tpu.memory_space<vmem>>, %arg8: memref<8x128xf32, #tpu.memory_space<vmem>>) attributes {dimension_semantics = [#tpu.dimension_semantics<parallel>], iteration_bounds = array<i64: 1>, scalar_prefetch = 0 : i64, scratch_operands = 0 : i64, tpu.core_type = #tpu.core_type<tc>, window_params = [{transform_indices = @transform_0, window_bounds = array<i64: 8, 32>}, {pipeline_mode = #tpu.pipeline_mode<synchronous>, transform_indices = @transform_1, window_bounds = array<i64: 32, 32>}, {pipeline_mode = #tpu.pipeline_mode<synchronous>, transform_indices = @transform_2, window_bounds = array<i64: 1, 32>}, {pipeline_mode = #tpu.pipeline_mode<synchronous>, transform_indices = @transform_3, window_bounds = array<i64: 32, 32>}, {pipeline_mode = #tpu.pipeline_mode<synchronous>, transform_indices = @transform_4, window_bounds = array<i64: 1, 32>}, {pipeline_mode = #tpu.pipeline_mode<synchronous>, transform_indices = @transform_5, window_bounds = array<i64: 32, 128>}, {pipeline_mode = #tpu.pipeline_mode<synchronous>, transform_indices = @transform_6, window_bounds = array<i64: 1, 128>}, {transform_indices = @transform_7, window_bounds = array<i64: 8, 128>}]} {
    %c0 = arith.constant 0 : index
    %c0_0 = arith.constant 0 : index
    %0 = vector.load %arg1[%c0, %c0_0] : memref<8x32xf32, #tpu.memory_space<vmem>>, vector<8x32xf32>
    %c0_1 = arith.constant 0 : index
    %c0_2 = arith.constant 0 : index
    %1 = vector.load %arg2[%c0_1, %c0_2] : memref<32x32xf32, #tpu.memory_space<vmem>>, vector<32x32xf32>
    %cst = arith.constant dense<0.000000e+00> : vector<8x32xf32>
    %2 = tpu.matmul %0, %1, %cst {dimension_numbers = #tpu.dot_dimension_numbers<[1], [0], [0], [1], [0, 0, 1, 1], [], []>} : vector<8x32xf32>, vector<32x32xf32>, vector<8x32xf32> -> vector<8x32xf32>
    %c0_3 = arith.constant 0 : index
    %c0_4 = arith.constant 0 : index
    %3 = vector.load %arg3[%c0_3, %c0_4] : memref<1x32xf32, #tpu.memory_space<vmem>>, vector<1x32xf32>
    %4 = vector.broadcast %3 : vector<1x32xf32> to vector<8x32xf32>
    %5 = arith.addf %2, %4 : vector<8x32xf32>
    %6 = math.tanh %5 : vector<8x32xf32>
    %c0_5 = arith.constant 0 : index
    %c0_6 = arith.constant 0 : index
    %7 = vector.load %arg4[%c0_5, %c0_6] : memref<32x32xf32, #tpu.memory_space<vmem>>, vector<32x32xf32>
    %cst_7 = arith.constant dense<0.000000e+00> : vector<8x32xf32>
    %8 = tpu.matmul %6, %7, %cst_7 {dimension_numbers = #tpu.dot_dimension_numbers<[1], [0], [0], [1], [0, 0, 1, 1], [], []>} : vector<8x32xf32>, vector<32x32xf32>, vector<8x32xf32> -> vector<8x32xf32>
    %c0_8 = arith.constant 0 : index
    %c0_9 = arith.constant 0 : index
    %9 = vector.load %arg5[%c0_8, %c0_9] : memref<1x32xf32, #tpu.memory_space<vmem>>, vector<1x32xf32>
    %10 = vector.broadcast %9 : vector<1x32xf32> to vector<8x32xf32>
    %11 = arith.addf %8, %10 : vector<8x32xf32>
    %12 = math.tanh %11 : vector<8x32xf32>
    %c0_10 = arith.constant 0 : index
    %c0_11 = arith.constant 0 : index
    %13 = vector.load %arg6[%c0_10, %c0_11] : memref<32x128xf32, #tpu.memory_space<vmem>>, vector<32x128xf32>
    %cst_12 = arith.constant dense<0.000000e+00> : vector<8x128xf32>
    %14 = tpu.matmul %12, %13, %cst_12 {dimension_numbers = #tpu.dot_dimension_numbers<[1], [0], [0], [1], [0, 0, 1, 1], [], []>} : vector<8x32xf32>, vector<32x128xf32>, vector<8x128xf32> -> vector<8x128xf32>
    %c0_13 = arith.constant 0 : index
    %c0_14 = arith.constant 0 : index
    %15 = vector.load %arg7[%c0_13, %c0_14] : memref<1x128xf32, #tpu.memory_space<vmem>>, vector<1x128xf32>
    %16 = vector.broadcast %15 : vector<1x128xf32> to vector<8x128xf32>
    %17 = arith.addf %14, %16 : vector<8x128xf32>
    %c0_15 = arith.constant 0 : index
    %c0_16 = arith.constant 0 : index
    %18 = vector.load %arg8[%c0_15, %c0_16] : memref<8x128xf32, #tpu.memory_space<vmem>>, vector<8x128xf32>
    tpu.vector_store %arg8[%c0_15, %c0_16], %17 {strides = array<i32>} : memref<8x128xf32, #tpu.memory_space<vmem>>, vector<8x128xf32>,
    return
  }
  func.func @transform_0(%arg0: i32) -> (i32, i32) {
    %c0_i32 = arith.constant 0 : i32
    %c0_i32_0 = arith.constant 0 : i32
    return %arg0, %c0_i32 : i32, i32
  }
  func.func @transform_1(%arg0: i32) -> (i32, i32) {
    %c0_i32 = arith.constant 0 : i32
    %c0_i32_0 = arith.constant 0 : i32
    %c0_i32_1 = arith.constant 0 : i32
    return %c0_i32, %c0_i32_0 : i32, i32
  }
  func.func @transform_2(%arg0: i32) -> (i32, i32) {
    %c0_i32 = arith.constant 0 : i32
    %c0_i32_0 = arith.constant 0 : i32
    %c0_i32_1 = arith.constant 0 : i32
    return %c0_i32, %c0_i32_0 : i32, i32
  }
  func.func @transform_3(%arg0: i32) -> (i32, i32) {
    %c0_i32 = arith.constant 0 : i32
    %c0_i32_0 = arith.constant 0 : i32
    %c0_i32_1 = arith.constant 0 : i32
    return %c0_i32, %c0_i32_0 : i32, i32
  }
  func.func @transform_4(%arg0: i32) -> (i32, i32) {
    %c0_i32 = arith.constant 0 : i32
    %c0_i32_0 = arith.constant 0 : i32
    %c0_i32_1 = arith.constant 0 : i32
    return %c0_i32, %c0_i32_0 : i32, i32
  }
  func.func @transform_5(%arg0: i32) -> (i32, i32) {
    %c0_i32 = arith.constant 0 : i32
    %c0_i32_0 = arith.constant 0 : i32
    %c0_i32_1 = arith.constant 0 : i32
    return %c0_i32, %c0_i32_0 : i32, i32
  }
  func.func @transform_6(%arg0: i32) -> (i32, i32) {
    %c0_i32 = arith.constant 0 : i32
    %c0_i32_0 = arith.constant 0 : i32
    %c0_i32_1 = arith.constant 0 : i32
    return %c0_i32, %c0_i32_0 : i32, i32
  }
  func.func @transform_7(%arg0: i32) -> (i32, i32) {
    %c0_i32 = arith.constant 0 : i32
    %c0_i32_0 = arith.constant 0 : i32
    return %arg0, %c0_i32 : i32, i32
  }
}

</mosaic_0001>

<bundles_post_ra>
// kernel: tpu_custom_call.1
= control target key start
LH: loop header
LB: loop body
LE: loop exit
PB: predicated region body
PF: predicated region fallthrough
CT: control target
= control target key end

     0   :  { %12 = vsyncpa [#allocation3], 0  ;;  %s692_s0 = inlined_call_operand.hbm [shape: f32[8,32], index: 0, kind: input, shape index: {}]   ;;  %s693_s1 = inlined_call_operand.hbm [shape: f32[32,32], index: 1, kind: input, shape index: {}]   ;;  %s694_s2 = inlined_call_operand.vmem [shape: f32[1,32], index: 2, kind: input, shape index: {}]   ;;  %s695_s3 = inlined_call_operand.hbm [shape: f32[32,32], index: 3, kind: input, shape index: {}]   ;;  %s696_s4 = inlined_call_operand.vmem [shape: f32[1,32], index: 4, kind: input, shape index: {}]   ;;  %s697_s5 = inlined_call_operand.hbm [shape: f32[32,128], index: 5, kind: input, shape index: {}]   ;;  %s698_s6 = inlined_call_operand.vmem [shape: f32[1,128], index: 6, kind: input, shape index: {}]   ;;  %s699_s7 = inlined_call_operand.hbm [shape: f32[8,128], index: 7, kind: output, shape index: {}]  }
   0x1   :  { %13 = vsyncpa [#allocation6], 0 }
   0x2   :  { %14 = vsyncpa [#allocation9], 0 }
   0x3   :  { %15 = vsyncpa [#allocation4], 0  ;;  %s558_s24 = smov [#allocation5]   ;;  %s440_s28 = scalar_lea.hbm %s693_s1, 512 }
   0x4   :  { %s31_s25 = sshll.u32 %s558_s24, 4  ;;  %p441_p0 = scmp.ne.s32.totalorder %s693_s1, %s440_s28  ;;  %s32_s25 = int_to_ptr.vmem [resolvable:$true] %s31_s25 }
   0x5   :  { %p444_p1 = scmp.lt.u32.totalorder %s440_s28, %s693_s1 }
   0x7   :  { %p446_p2 = pnand %p444_p1, %p441_p0 }
   0x9   :  { %449 = shalt.err (!%p446_p2)
}
   0xa   :  { %s450_s10 = scalar_lea.vmem %s32_s25, 512  ;;  %p455_p4 = scmp.lt.s32.totalorder %s32_s25, %s32_s25 }
   0xb   :  { %p451_p3 = scmp.ne.s32.totalorder %s32_s25, %s450_s10  ;;  %p456_p5 = scmp.lt.s32.totalorder %s450_s10, %s450_s10 }
   0xd   :  { %p457_p6 = por %p456_p5, %p455_p4 }
   0xf   :  { %p458_p7 = pnand %p457_p6, %p451_p3 }
  0x11   :  { %461 = shalt.err (!%p458_p7)
}
  0x12   :  { %s559_s11 = smov 128   ;;  %s560_s12 = smov 8  }
  0x13   :  { %37 = dma.hbm_to_vmem [thread:$0]  %s693_s1, 512, %s32_s25, [#allocation6], %s559_s11, %s559_s11, %s560_s12  }
  0x14   :  { %s561_s15 = smov [#allocation2]   ;;  %s562_s17 = smov [#allocation7]  }
  0x15   :  { %s22_s16 = sshll.u32 %s561_s15, 4  ;;  %s45_s18 = sshll.u32 %s562_s17, 4  ;;  %s23_s16 = int_to_ptr.vmem [resolvable:$true] %s22_s16  ;;  %s46_s18 = int_to_ptr.vmem [resolvable:$true] %s45_s18 }
  0x16   :  { %s462_s21 = scalar_lea.hbm %s692_s0, 128 }
  0x17   :  { %p463_p8 = scmp.ne.s32.totalorder %s692_s0, %s462_s21  ;;  %p466_p9 = scmp.lt.u32.totalorder %s462_s21, %s692_s0 }
  0x19   :  { %p468_p10 = pnand %p466_p9, %p463_p8 }
  0x1b   :  { %471 = shalt.err (!%p468_p10)
}
  0x1c   :  { %s472_s1 = scalar_lea.vmem %s23_s16, 128  ;;  %p477_p12 = scmp.lt.s32.totalorder %s23_s16, %s23_s16 }
  0x1d   :  { %p473_p11 = scmp.ne.s32.totalorder %s23_s16, %s472_s1  ;;  %p478_p13 = scmp.lt.s32.totalorder %s472_s1, %s472_s1 }
  0x1f   :  { %p479_p0 = por %p478_p13, %p477_p12 }
  0x21   :  { %p480_p1 = pnand %p479_p0, %p473_p11 }
  0x23   :  { %483 = shalt.err (!%p480_p1)
}
  0x24   :  { %25 = dma.hbm_to_vmem [thread:$0]  %s692_s0, 128, %s23_s16, [#allocation3]  }
  0x25   :  { %s484_s30 = scalar_lea.hbm %s695_s3, 512 }
  0x26   :  { %p485_p2 = scmp.ne.s32.totalorder %s695_s3, %s484_s30  ;;  %p488_p3 = scmp.lt.u32.totalorder %s484_s30, %s695_s3 }
  0x28   :  { %p490_p4 = pnand %p488_p3, %p485_p2 }
  0x2a   :  { %493 = shalt.err (!%p490_p4)
}
  0x2b   :  { %s494_s14 = scalar_lea.vmem %s46_s18, 512  ;;  %p499_p6 = scmp.lt.s32.totalorder %s46_s18, %s46_s18 }
  0x2c   :  { %p495_p5 = scmp.ne.s32.totalorder %s46_s18, %s494_s14  ;;  %p500_p7 = scmp.lt.s32.totalorder %s494_s14, %s494_s14 }
  0x2e   :  { %p501_p8 = por %p500_p7, %p499_p6 }
  0x30   :  { %p502_p9 = pnand %p501_p8, %p495_p5 }
  0x32   :  { %505 = shalt.err (!%p502_p9)
}
  0x33   :  { %51 = dma.hbm_to_vmem [thread:$0]  %s695_s3, 512, %s46_s18, [#allocation6], %s559_s11, %s559_s11, %s560_s12  }
  0x34   :  { %s563_s16 = smov [#allocation8]   ;;  %s506_s21 = scalar_lea.hbm %s697_s5, 512 }
  0x35   :  { %s59_s17 = sshll.u32 %s563_s16, 4  ;;  %p507_p10 = scmp.ne.s32.totalorder %s697_s5, %s506_s21  ;;  %s60_s17 = int_to_ptr.vmem [resolvable:$true] %s59_s17 }
  0x36   :  { %p510_p11 = scmp.lt.u32.totalorder %s506_s21, %s697_s5 }
  0x38   :  { %p512_p12 = pnand %p510_p11, %p507_p10 }
  0x3a   :  { %515 = shalt.err (!%p512_p12)
}
  0x3b   :  { %s516_s1 = scalar_lea.vmem %s60_s17, 512  ;;  %p521_p0 = scmp.lt.s32.totalorder %s60_s17, %s60_s17 }
  0x3c   :  { %p517_p13 = scmp.ne.s32.totalorder %s60_s17, %s516_s1  ;;  %p522_p1 = scmp.lt.s32.totalorder %s516_s1, %s516_s1 }
  0x3e   :  { %p523_p2 = por %p522_p1, %p521_p0 }
  0x40   :  { %p524_p3 = pnand %p523_p2, %p517_p13 }
  0x42   :  { %527 = shalt.err (!%p524_p3)
}
  0x43   :  { %65 = dma.hbm_to_vmem [thread:$0]  %s697_s5, 512, %s60_s17, [#allocation9], %s559_s11, %s559_s11, %s560_s12  }
  0x44   :  { %550 = dma.done.wait [#allocation3], 128  }
  0x45   :  { %551 = vsyncadd [#allocation3], 4294967168 }
  0x46   :  { %552 = dma.done.wait [#allocation6], 1024  }
  0x47   :  { %553 = vsyncadd [#allocation6], 4294966272 }
  0x48   :  { %554 = dma.done.wait [#allocation9], 512  }
  0x49   :  { %555 = vsyncadd [#allocation9], 4294966784  ;;  %v564_v0 = vmov 0.0|0.0   ;;  %vm565_vm0 = vmmov 0   ;;  %v566_v1 = vmov 0.0   ;;  %v81_v2 = vld [vmem:[#allocation5] sm:$0xff] }
  0x4a   :  { %408 = vmatprep.subr.bf16.mxu0 %v564_v0  ;;  %383 = vmatprep.mubr.msk.f32.mxu0 %vm565_vm0, %v566_v1  ;;  %v82_v3 = vld [vmem:[#allocation5 + $0x8] sm:$0xff]  ;;  %v83_v4 = vld [vmem:[#allocation5 + $0x10] sm:$0xff]  ;;  %v84_v6 = vld [vmem:[#allocation5 + $0x18] sm:$0xff]  ;;  %vm92_vm1 = vcmask 261120   ;;  %s567_s28 = smov [#allocation10]  }
  0x4b   :  { %414 = vmatprep.subr.bf16.mxu1 %v564_v0  ;;  %394 = vmatprep.mubr.msk.f32.mxu1 %vm565_vm0, %v566_v1  ;;  %v409_v5 = vpack.c.bf16 %v82_v3, %v81_v2  ;;  %v412_v7 = vpack.c.bf16 %v84_v6, %v83_v4  ;;  %v80_v8 = vld [vmem:[#allocation2] sm:$0xff]  ;;  %v167_v9 = vld [vmem:[#allocation7] sm:$0xff]  ;;  %v168_v10 = vld [vmem:[#allocation7 + $0x8] sm:$0xff]  ;;  %s343_s29 = sshll.u32 %s567_s28, 4  ;;  %s344_s29 = int_to_ptr.vmem [resolvable:$true] %s343_s29 }
  0x4c   :  { %v169_v11 = vld [vmem:[#allocation7 + $0x10] sm:$0xff]  ;;  %v415_v12 = vpack.c.bf16 %v168_v10, %v167_v9  ;;  %v170_v13 = vld [vmem:[#allocation7 + $0x18] sm:$0xff]  ;;  %v252_v20 = vld [vmem:[#allocation8] sm:$0xff]  ;;  %s528_s30 = scalar_lea.vmem %s344_s29, 128  ;;  %p533_p5 = scmp.lt.s32.totalorder %s344_s29, %s344_s29 }
  0x4d   :  { %410 = vmatpush3.bf16.msra.mxu0 %v409_v5  ;;  %v418_v14 = vpack.c.bf16 %v170_v13, %v169_v11  ;;  %v354_v15 = vld [vmem:[%s694_s2] ss:$0 sm:$0xff]  ;;  %v253_v21 = vld [vmem:[#allocation8 + $0x8] sm:$0xff]  ;;  %v254_v22 = vld [vmem:[#allocation8 + $0x10] sm:$0xff]  ;;  %p529_p4 = scmp.ne.s32.totalorder %s344_s29, %s528_s30  ;;  %p534_p6 = scmp.lt.s32.totalorder %s528_s30, %s528_s30 }
  0x4e   :  { %411 = vmatprep.subr.bf16.mxu0 %v564_v0  ;;  %416 = vmatpush3.bf16.msra.mxu1 %v415_v12  ;;  %v421_v23 = vpack.c.bf16 %v253_v21, %v252_v20  ;;  %v255_v24 = vld [vmem:[#allocation8 + $0x18] sm:$0xff] }
  0x4f   :  { %417 = vmatprep.subr.bf16.mxu1 %v564_v0  ;;  %v424_v25 = vpack.c.bf16 %v255_v24, %v254_v22  ;;  %v356_v26 = vld [vmem:[%s696_s4] ss:$0 sm:$0xff]  ;;  %p535_p7 = por %p534_p6, %p533_p5 }
  0x50   :  { %v358_v31 = vld [vmem:[%s698_s6] ss:$0 sm:$0xff] }
  0x51   :  { %413 = vmatpush3.bf16.msra.mxu0 %v412_v7  ;;  %p536_p8 = pnand %p535_p7, %p529_p4 }
  0x52   :  { %420 = vmatprep.subr.bf16.mxu0 %v564_v0  ;;  %419 = vmatpush3.bf16.msra.mxu1 %v418_v14 }
  0x54   :  { %384 = vmatmul.mubr.msk.f32.vlgmr.msra.gmra.mrb[0].mxu0 %vm92_vm1, %v80_v8 }
  0x55   :  { %405 = vmatprep.mubr.msk.f32.mxu0 %vm565_vm0, %v566_v1  ;;  %422 = vmatpush3.bf16.msra.mxu0 %v421_v23 }
  0x56   :  { %423 = vmatprep.subr.bf16.mxu0 %v564_v0 }
  0x59   :  { %425 = vmatpush3.bf16.msra.mxu0 %v424_v25 }
 0x127   :  { %v162_v16 = vpop.f32.mrb[0].mxu0 }
 0x128   :  { %v163_v17 = vadd.f32 %v354_v15, %v162_v16  ;;  %v385_v18 = vpop.f32.mrb[1].mxu0 }
 0x12a   :  { %436 = vtanh.f32 %v163_v17 }
 0x134   :  { %v437_v19 = vpop.eup %436 }
 0x135   :  { %395 = vmatmul.mubr.msk.f32.vlgmr.msra.gmra.mrb[0].mxu1 %vm92_vm1, %v437_v19 }
 0x208   :  { %v247_v27 = vpop.f32.mrb[0].mxu1 }
 0x209   :  { %v248_v28 = vadd.f32 %v356_v26, %v247_v27  ;;  %v396_v29 = vpop.f32.mrb[1].mxu1 }
 0x20b   :  { %438 = vtanh.f32 %v248_v28 }
 0x215   :  { %v439_v30 = vpop.eup %438 }
 0x216   :  { %406 = vmatmul.mubr.msk.f32.vlgmr.msra.gmra.mrb[2].mxu0 %vm92_vm1, %v439_v30 }
 0x2e9   :  { %v332_v32 = vpop.f32.mrb[2].mxu0 }
 0x2ea   :  { %v333_v33 = vadd.f32 %v358_v31, %v332_v32  ;;  %v407_v34 = vpop.f32.mrb[3].mxu0 }
 0x2ec   :  { %336 = vst [vmem:[#allocation10] sm:$0xff] %v333_v33 }
 0x2ed   :  { %539 = shalt.err (!%p536_p8)
}
 0x2ee   :  { %s540_s9 = scalar_lea.hbm %s699_s7, 128 }
 0x2ef   :  { %p541_p9 = scmp.ne.s32.totalorder %s699_s7, %s540_s9  ;;  %p544_p10 = scmp.lt.u32.totalorder %s540_s9, %s699_s7 }
 0x2f1   :  { %p546_p11 = pnand %p544_p10, %p541_p9 }
 0x2f3   :  { %549 = shalt.err (!%p546_p11)
}
 0x2f4   :  { %346 = dma.vmem_to_hbm [thread:$0]  %s344_s29, 128, %s699_s7, [#allocation4]  }
 0x2f5   :  { %556 = dma.done.wait [#allocation4], 128  }
 0x2f6   :  { %557 = vsyncadd [#allocation4], 4294967168 }
 0x2f7   :  { %350 = vsyncpa [#allocation3], 1 }
 0x2f8   :  { %351 = vsyncpa [#allocation6], 1 }
 0x2f9   :  { %352 = vsyncpa [#allocation9], 1 }
 0x2fa   :  { %353 = vsyncpa [#allocation4], 1 }

</bundles_post_ra>
